<compile_context>
chip_gen: v7x
topology: tpu7x:2x2x1
jax: 0.10.0
libtpu: 0.0.40
codegen_flags: <defaults>
</compile_context>

<pallas_src>
import jax
import jax.numpy as jnp
from jax.experimental import pallas as pl
from jax.experimental.pallas import tpu as pltpu

STATE_SIZE = 4       # CartPole-v1 observation dim
ACTION_SIZE = 2      # CartPole-v1 action dim
HIDDEN = 24
PAD = 128            # lane width: hidden dim padded to this (only the hidden dim)
DEFAULT_BLOCK_ROWS = 1024   # batch tile for large-batch (replay buffer) eval


def dqn_kernel(x_ref, w1_ref, b1_ref, w2_ref, b2_ref, w3_ref, b3_ref, o_ref):
    # Dot-input dtype (f32 or bf16); accumulation is always f32, and all VPU
    # elementwise (bias add, ReLU) is f32 so the kernel is safe on v5e too.
    cdt = w1_ref.dtype
    x = x_ref[...]                                                  # (TB, 4)

    # fc1 + ReLU  (K = STATE_SIZE = 4, masked on the MXU; zero-padded hidden
    # columns of w1/b1 stay exactly zero through the ReLU)
    h1 = jnp.dot(x, w1_ref[...], preferred_element_type=jnp.float32)
    h1 = jnp.maximum(h1 + b1_ref[...], 0.0)                         # (TB, 128) f32

    # fc2 + ReLU  (zero rows of w2 kill any padded-lane contribution)
    h2 = jnp.dot(h1.astype(cdt), w2_ref[...],
                 preferred_element_type=jnp.float32)
    h2 = jnp.maximum(h2 + b2_ref[...], 0.0)                         # (TB, 128) f32

    # fc3 (no activation) -- narrow N = ACTION_SIZE = 2 output, masked store
    out = jnp.dot(h2.astype(cdt), w3_ref[...],
                  preferred_element_type=jnp.float32)
    o_ref[...] = (out + b3_ref[...]).astype(o_ref.dtype)            # (TB, 2)


def _round_up(n, m):
    return ((n + m - 1) // m) * m


def dqn_forward(x, padded_params, *, block_rows=DEFAULT_BLOCK_ROWS):
    """x: (B, STATE_SIZE) f32.  padded_params: minimally padded weights/biases."""
    w1, b1, w2, b2, w3, b3 = padded_params
    B = x.shape[0]

    # Batch tile: multiple of 8 (sublane granularity), at most `block_rows`,
    # and chosen so there are >=2 grid tiles whenever B > 8 so the "parallel"
    # batch axis can span both TensorCores on v7x.
    b8 = _round_up(B, 8)
    tb = max(8, min(block_rows, _round_up(pl.cdiv(b8, 2), 8)))
    b_pad = _round_up(B, tb)

    # Cast once to the weight/DMA dtype (f32 or bf16) and row-pad only.
    xc = x.astype(w1.dtype)
    if b_pad != B:
        xc = jnp.pad(xc, ((0, b_pad - B), (0, 0)))

    grid = (b_pad // tb,)

    # Weights/biases: full-array blocks, index_map pinned to (0, 0) so they are
    # DMA'd into VMEM exactly once and stay resident across all batch tiles.
    def resident(arr):
        return pl.BlockSpec(arr.shape, lambda i: (0, 0))

    out = pl.pallas_call(
        dqn_kernel,
        out_shape=jax.ShapeDtypeStruct((b_pad, ACTION_SIZE), jnp.float32),
        grid=grid,
        in_specs=[
            pl.BlockSpec((tb, STATE_SIZE), lambda i: (i, 0)),   # x, batch-tiled
            resident(w1), resident(b1),
            resident(w2), resident(b2),
            resident(w3), resident(b3),
        ],
        out_specs=pl.BlockSpec((tb, ACTION_SIZE), lambda i: (i, 0)),
        compiler_params=pltpu.CompilerParams(
            dimension_semantics=("parallel",)),   # megacore split on v7x
    )(xc, w1, b1, w2, b2, w3, b3)

    # Only padded batch rows (if any) need trimming.
    return out[:B] if b_pad != B else out


def init_params(key):
    """nn.Linear-style U(-1/sqrt(fan_in), 1/sqrt(fan_in)) init.

    Returns exact (in, out) weights / (1, out) biases for the reference path.
    """
    ks = jax.random.split(key, 6)

    def linear(kw, kb, fan_in, fan_out):
        bound = 1.0 / jnp.sqrt(jnp.float32(fan_in))
        # stored as (in, out) so kernel does x @ W  (== PyTorch x @ W.T)
        w = jax.random.uniform(kw, (fan_in, fan_out), jnp.float32, -bound, bound)
        b = jax.random.uniform(kb, (1, fan_out), jnp.float32, -bound, bound)
        return w, b

    w1, b1 = linear(ks[0], ks[1], STATE_SIZE, HIDDEN)
    w2, b2 = linear(ks[2], ks[3], HIDDEN, HIDDEN)
    w3, b3 = linear(ks[4], ks[5], HIDDEN, ACTION_SIZE)
    return (w1, b1, w2, b2, w3, b3)


def pad_params(params, param_dtype=jnp.float32):
    """Pad only the hidden dim to 128 lanes; keep real K=4 / N=2 edges.

    `param_dtype` controls the weight/MXU-input dtype (f32 or bf16); biases are
    always f32 so bias-add / ReLU stay on the f32 VPU path (v5e-safe).
    """
    w1, b1, w2, b2, w3, b3 = params
    w1p = jnp.zeros((STATE_SIZE, PAD), jnp.float32).at[:, :HIDDEN].set(w1)
    b1p = jnp.zeros((1, PAD), jnp.float32).at[:, :HIDDEN].set(b1)
    w2p = jnp.zeros((PAD, PAD), jnp.float32).at[:HIDDEN, :HIDDEN].set(w2)
    b2p = jnp.zeros((1, PAD), jnp.float32).at[:, :HIDDEN].set(b2)
    w3p = jnp.zeros((PAD, ACTION_SIZE), jnp.float32).at[:HIDDEN, :].set(w3)
    b3p = b3  # (1, ACTION_SIZE), no padding needed
    return (w1p.astype(param_dtype), b1p,
            w2p.astype(param_dtype), b2p,
            w3p.astype(param_dtype), b3p)


def dqn_reference(x, params):
    """Plain-JAX reference (unpadded) for correctness checking."""
    w1, b1, w2, b2, w3, b3 = params
    h1 = jnp.maximum(x @ w1 + b1, 0.0)
    h2 = jnp.maximum(h1 @ w2 + b2, 0.0)
    return h2 @ w3 + b3


if __name__ == "__main__":
    key = jax.random.PRNGKey(0)
    k_params, k_x = jax.random.split(key)

    params = init_params(k_params)
    padded_f32 = pad_params(params, jnp.float32)

    # Small action-selection style batch.
    batch = 8
    x = jax.random.normal(k_x, (batch, STATE_SIZE), dtype=jnp.float32)
    out = jax.block_until_ready(dqn_forward(x, padded_f32))
    ref = dqn_reference(x, params)
    assert out.shape == (batch, ACTION_SIZE), out.shape
    assert jnp.allclose(out, ref, atol=1e-5, rtol=1e-5)

    # Large replay-buffer batch, deliberately not a multiple of the tile:
    # exercises multi-tile grid (weights DMA'd once, resident) + row padding.
    big_batch = 1024 + 37
    xb = jax.random.normal(jax.random.PRNGKey(1), (big_batch, STATE_SIZE),
                           dtype=jnp.float32)
    out_b = jax.block_until_ready(dqn_forward(xb, padded_f32))
    ref_b = dqn_reference(xb, params)
    assert out_b.shape == (big_batch, ACTION_SIZE), out_b.shape
    assert jnp.allclose(out_b, ref_b, atol=1e-5, rtol=1e-5)

    # bf16 weight/input DMA + bf16 MXU inputs with f32 accumulation
    # (the v6e/v7x lever; VPU math stays f32 so this also runs on v5e).
    padded_bf16 = pad_params(params, jnp.bfloat16)
    out_bf = jax.block_until_ready(dqn_forward(xb, padded_bf16))
    assert out_bf.shape == (big_batch, ACTION_SIZE), out_bf.shape
    assert jnp.allclose(out_bf, ref_b, atol=1e-1, rtol=1e-1)

    print("KERNEL_OK")
</pallas_src>

<mosaic_0001>
module attributes {stable_mosaic.version = 11 : i64} {
  func.func @dqn_kernel(%arg0: i32, %arg1: memref<8x4xf32, #tpu.memory_space<vmem>>, %arg2: memref<4x128xf32, #tpu.memory_space<vmem>>, %arg3: memref<1x128xf32, #tpu.memory_space<vmem>>, %arg4: memref<128x128xf32, #tpu.memory_space<vmem>>, %arg5: memref<1x128xf32, #tpu.memory_space<vmem>>, %arg6: memref<128x2xf32, #tpu.memory_space<vmem>>, %arg7: memref<1x2xf32, #tpu.memory_space<vmem>>, %arg8: memref<8x2xf32, #tpu.memory_space<vmem>>) attributes {dimension_semantics = [#tpu.dimension_semantics<parallel>], iteration_bounds = array<i64: 1>, scalar_prefetch = 0 : i64, scratch_operands = 0 : i64, tpu.core_type = #tpu.core_type<tc>, window_params = [{transform_indices = @transform_0, window_bounds = array<i64: 8, 4>}, {pipeline_mode = #tpu.pipeline_mode<synchronous>, transform_indices = @transform_1, window_bounds = array<i64: 4, 128>}, {pipeline_mode = #tpu.pipeline_mode<synchronous>, transform_indices = @transform_2, window_bounds = array<i64: 1, 128>}, {pipeline_mode = #tpu.pipeline_mode<synchronous>, transform_indices = @transform_3, window_bounds = array<i64: 128, 128>}, {pipeline_mode = #tpu.pipeline_mode<synchronous>, transform_indices = @transform_4, window_bounds = array<i64: 1, 128>}, {pipeline_mode = #tpu.pipeline_mode<synchronous>, transform_indices = @transform_5, window_bounds = array<i64: 128, 2>}, {pipeline_mode = #tpu.pipeline_mode<synchronous>, transform_indices = @transform_6, window_bounds = array<i64: 1, 2>}, {transform_indices = @transform_7, window_bounds = array<i64: 8, 2>}]} {
    %c0 = arith.constant 0 : index
    %c0_0 = arith.constant 0 : index
    %0 = vector.load %arg1[%c0, %c0_0] : memref<8x4xf32, #tpu.memory_space<vmem>>, vector<8x4xf32>
    %c0_1 = arith.constant 0 : index
    %c0_2 = arith.constant 0 : index
    %1 = vector.load %arg2[%c0_1, %c0_2] : memref<4x128xf32, #tpu.memory_space<vmem>>, vector<4x128xf32>
    %cst = arith.constant dense<0.000000e+00> : vector<8x128xf32>
    %2 = tpu.matmul %0, %1, %cst {dimension_numbers = #tpu.dot_dimension_numbers<[1], [0], [0], [1], [0, 0, 1, 1], [], []>} : vector<8x4xf32>, vector<4x128xf32>, vector<8x128xf32> -> vector<8x128xf32>
    %c0_3 = arith.constant 0 : index
    %c0_4 = arith.constant 0 : index
    %3 = vector.load %arg3[%c0_3, %c0_4] : memref<1x128xf32, #tpu.memory_space<vmem>>, vector<1x128xf32>
    %4 = vector.broadcast %3 : vector<1x128xf32> to vector<8x128xf32>
    %5 = arith.addf %2, %4 : vector<8x128xf32>
    %cst_5 = arith.constant 0.000000e+00 : f32
    %6 = vector.broadcast %cst_5 : f32 to vector<8x128xf32>
    %7 = arith.maximumf %5, %6 : vector<8x128xf32>
    %c0_6 = arith.constant 0 : index
    %c0_7 = arith.constant 0 : index
    %8 = vector.load %arg4[%c0_6, %c0_7] : memref<128x128xf32, #tpu.memory_space<vmem>>, vector<128x128xf32>
    %cst_8 = arith.constant dense<0.000000e+00> : vector<8x128xf32>
    %9 = tpu.matmul %7, %8, %cst_8 {dimension_numbers = #tpu.dot_dimension_numbers<[1], [0], [0], [1], [0, 0, 1, 1], [], []>} : vector<8x128xf32>, vector<128x128xf32>, vector<8x128xf32> -> vector<8x128xf32>
    %c0_9 = arith.constant 0 : index
    %c0_10 = arith.constant 0 : index
    %10 = vector.load %arg5[%c0_9, %c0_10] : memref<1x128xf32, #tpu.memory_space<vmem>>, vector<1x128xf32>
    %11 = vector.broadcast %10 : vector<1x128xf32> to vector<8x128xf32>
    %12 = arith.addf %9, %11 : vector<8x128xf32>
    %cst_11 = arith.constant 0.000000e+00 : f32
    %13 = vector.broadcast %cst_11 : f32 to vector<8x128xf32>
    %14 = arith.maximumf %12, %13 : vector<8x128xf32>
    %c0_12 = arith.constant 0 : index
    %c0_13 = arith.constant 0 : index
    %15 = vector.load %arg6[%c0_12, %c0_13] : memref<128x2xf32, #tpu.memory_space<vmem>>, vector<128x2xf32>
    %cst_14 = arith.constant dense<0.000000e+00> : vector<8x2xf32>
    %16 = tpu.matmul %14, %15, %cst_14 {dimension_numbers = #tpu.dot_dimension_numbers<[1], [0], [0], [1], [0, 0, 1, 1], [], []>} : vector<8x128xf32>, vector<128x2xf32>, vector<8x2xf32> -> vector<8x2xf32>
    %c0_15 = arith.constant 0 : index
    %c0_16 = arith.constant 0 : index
    %17 = vector.load %arg7[%c0_15, %c0_16] : memref<1x2xf32, #tpu.memory_space<vmem>>, vector<1x2xf32>
    %18 = vector.broadcast %17 : vector<1x2xf32> to vector<8x2xf32>
    %19 = arith.addf %16, %18 : vector<8x2xf32>
    %c0_17 = arith.constant 0 : index
    %c0_18 = arith.constant 0 : index
    %20 = vector.load %arg8[%c0_17, %c0_18] : memref<8x2xf32, #tpu.memory_space<vmem>>, vector<8x2xf32>
    tpu.vector_store %arg8[%c0_17, %c0_18], %19 {strides = array<i32>} : memref<8x2xf32, #tpu.memory_space<vmem>>, vector<8x2xf32>,
    return
  }
  func.func @transform_0(%arg0: i32) -> (i32, i32) {
    %c0_i32 = arith.constant 0 : i32
    %c0_i32_0 = arith.constant 0 : i32
    return %arg0, %c0_i32 : i32, i32
  }
  func.func @transform_1(%arg0: i32) -> (i32, i32) {
    %c0_i32 = arith.constant 0 : i32
    %c0_i32_0 = arith.constant 0 : i32
    %c0_i32_1 = arith.constant 0 : i32
    return %c0_i32, %c0_i32_0 : i32, i32
  }
  func.func @transform_2(%arg0: i32) -> (i32, i32) {
    %c0_i32 = arith.constant 0 : i32
    %c0_i32_0 = arith.constant 0 : i32
    %c0_i32_1 = arith.constant 0 : i32
    return %c0_i32, %c0_i32_0 : i32, i32
  }
  func.func @transform_3(%arg0: i32) -> (i32, i32) {
    %c0_i32 = arith.constant 0 : i32
    %c0_i32_0 = arith.constant 0 : i32
    %c0_i32_1 = arith.constant 0 : i32
    return %c0_i32, %c0_i32_0 : i32, i32
  }
  func.func @transform_4(%arg0: i32) -> (i32, i32) {
    %c0_i32 = arith.constant 0 : i32
    %c0_i32_0 = arith.constant 0 : i32
    %c0_i32_1 = arith.constant 0 : i32
    return %c0_i32, %c0_i32_0 : i32, i32
  }
  func.func @transform_5(%arg0: i32) -> (i32, i32) {
    %c0_i32 = arith.constant 0 : i32
    %c0_i32_0 = arith.constant 0 : i32
    %c0_i32_1 = arith.constant 0 : i32
    return %c0_i32, %c0_i32_0 : i32, i32
  }
  func.func @transform_6(%arg0: i32) -> (i32, i32) {
    %c0_i32 = arith.constant 0 : i32
    %c0_i32_0 = arith.constant 0 : i32
    %c0_i32_1 = arith.constant 0 : i32
    return %c0_i32, %c0_i32_0 : i32, i32
  }
  func.func @transform_7(%arg0: i32) -> (i32, i32) {
    %c0_i32 = arith.constant 0 : i32
    %c0_i32_0 = arith.constant 0 : i32
    return %arg0, %c0_i32 : i32, i32
  }
}

</mosaic_0001>

<bundles_post_ra>
// kernel: tpu_custom_call.1
= control target key start
LH: loop header
LB: loop body
LE: loop exit
PB: predicated region body
PF: predicated region fallthrough
CT: control target
= control target key end

     0   :  { %vm39_vm0 = vcmask 1043456   ;;  %vm35_vm1 = vcmask 31744   ;;  %v474_v0 = vmov 0.0   ;;  %vm475_vm2 = vmmov 0   ;;  %s647_s1 = inlined_call_operand.vmem [shape: f32[4,128], index: 1, kind: input, shape index: {}]   ;;  %s648_s0 = inlined_call_operand.vmem [shape: f32[8,4], index: 0, kind: input, shape index: {}]   ;;  %s649_s3 = inlined_call_operand.vmem [shape: f32[128,128], index: 3, kind: input, shape index: {}]   ;;  %s650_s5 = inlined_call_operand.vmem [shape: f32[128,2], index: 5, kind: input, shape index: {}]   ;;  %s651_s2 = inlined_call_operand.vmem [shape: f32[1,128], index: 2, kind: input, shape index: {}]   ;;  %s652_s4 = inlined_call_operand.vmem [shape: f32[1,128], index: 4, kind: input, shape index: {}]   ;;  %s653_s6 = inlined_call_operand.vmem [shape: f32[1,2], index: 6, kind: input, shape index: {}]   ;;  %s654_s7 = inlined_call_operand.vmem [shape: f32[8,2], index: 7, kind: output, shape index: {}]  }
   0x1   :  { %348 = vmatprep.subr.mxu0 %v474_v0  ;;  %v27_v1 = vld [vmem:[%s647_s1] sm:$0xf]  ;;  %350 = vmatprep.mubr.msk.f32.mxu0 %vm475_vm2, %v474_v0  ;;  %v476_v4 = vmov 0.0|0.0   ;;  %v115_v5 = vld [vmem:[%s649_s3 + $0x8] sm:$0xff]  ;;  %v116_v6 = vld [vmem:[%s649_s3 + $0x10] sm:$0xff]  ;;  %vm301_vm3 = vcmask 15360  }
   0x2   :  { %v26_v2 = vld [vmem:[%s648_s0] sm:$0xff]  ;;  %349 = vmatpush3.msk.msra.mxu0 %vm39_vm0, %v27_v1  ;;  %423 = vmatprep.subr.bf16.mxu1 %v476_v4  ;;  %v117_v7 = vld [vmem:[%s649_s3 + $0x18] sm:$0xff]  ;;  %v119_v11 = vld [vmem:[%s649_s3 + $0x28] sm:$0xff] }
   0x3   :  { %v114_v3 = vld [vmem:[%s649_s3] sm:$0xff]  ;;  %351 = vmatmul.mubr.msk.f32.vlgmr.msra.gmra.mrb[0].mxu0 %vm35_vm1, %v26_v2  ;;  %385 = vmatprep.mubr.msk.f32.mxu1 %vm475_vm2, %v474_v0  ;;  %v427_v9 = vpack.c.bf16 %v117_v7, %v116_v6  ;;  %v120_v13 = vld [vmem:[%s649_s3 + $0x30] sm:$0xff]  ;;  %v121_v14 = vld [vmem:[%s649_s3 + $0x38] sm:$0xff] }
   0x4   :  { %v424_v8 = vpack.c.bf16 %v115_v5, %v114_v3  ;;  %447 = vmatprep.subr.bf16.mxu0 %v476_v4  ;;  %420 = vmatprep.mubr.msk.f32.mxu0 %vm475_vm2, %v474_v0  ;;  %v118_v10 = vld [vmem:[%s649_s3 + $0x20] sm:$0xff]  ;;  %v433_v15 = vpack.c.bf16 %v121_v14, %v120_v13  ;;  %v123_v17 = vld [vmem:[%s649_s3 + $0x48] sm:$0xff]  ;;  %v124_v19 = vld [vmem:[%s649_s3 + $0x50] sm:$0xff] }
   0x5   :  { %v430_v12 = vpack.c.bf16 %v119_v11, %v118_v10  ;;  %v122_v16 = vld [vmem:[%s649_s3 + $0x40] sm:$0xff]  ;;  %v125_v20 = vld [vmem:[%s649_s3 + $0x58] sm:$0xff]  ;;  %v127_v23 = vld [vmem:[%s649_s3 + $0x68] sm:$0xff] }
   0x6   :  { %425 = vmatpush3.bf16.msra.mxu1 %v424_v8  ;;  %v436_v18 = vpack.c.bf16 %v123_v17, %v122_v16  ;;  %v439_v21 = vpack.c.bf16 %v125_v20, %v124_v19  ;;  %v126_v22 = vld [vmem:[%s649_s3 + $0x60] sm:$0xff]  ;;  %v128_v25 = vld [vmem:[%s649_s3 + $0x70] sm:$0xff]  ;;  %v129_v26 = vld [vmem:[%s649_s3 + $0x78] sm:$0xff] }
   0x7   :  { %426 = vmatprep.subr.bf16.mxu1 %v476_v4  ;;  %v442_v24 = vpack.c.bf16 %v127_v23, %v126_v22  ;;  %v445_v27 = vpack.c.bf16 %v129_v26, %v128_v25  ;;  %v208_v28 = vld [vmem:[%s650_s5] sm:$0xff]  ;;  %v209_v29 = vld [vmem:[%s650_s5 + $0x8] sm:$0xff]  ;;  %v210_v30 = vld [vmem:[%s650_s5 + $0x10] sm:$0xff] }
   0x8   :  { %v448_v31 = vpack.c.bf16 %v209_v29, %v208_v28  ;;  %v211_v32 = vld [vmem:[%s650_s5 + $0x18] sm:$0xff]  ;;  %v212_v34 = vld [vmem:[%s650_s5 + $0x20] sm:$0xff]  ;;  %v213_v35 = vld [vmem:[%s650_s5 + $0x28] sm:$0xff] }
   0x9   :  { %v451_v33 = vpack.c.bf16 %v211_v32, %v210_v30  ;;  %v454_v36 = vpack.c.bf16 %v213_v35, %v212_v34  ;;  %v214_v37 = vld [vmem:[%s650_s5 + $0x30] sm:$0xff]  ;;  %v215_v38 = vld [vmem:[%s650_s5 + $0x38] sm:$0xff]  ;;  %v216_v40 = vld [vmem:[%s650_s5 + $0x40] sm:$0xff] }
   0xa   :  { %428 = vmatpush3.bf16.msra.mxu1 %v427_v9  ;;  %449 = vmatpush3.bf16.msra.mxu0 %v448_v31  ;;  %v457_v39 = vpack.c.bf16 %v215_v38, %v214_v37  ;;  %v217_v41 = vld [vmem:[%s650_s5 + $0x48] sm:$0xff]  ;;  %v218_v43 = vld [vmem:[%s650_s5 + $0x50] sm:$0xff]  ;;  %v219_v44 = vld [vmem:[%s650_s5 + $0x58] sm:$0xff] }
   0xb   :  { %429 = vmatprep.subr.bf16.mxu1 %v476_v4  ;;  %450 = vmatprep.subr.bf16.mxu0 %v476_v4  ;;  %v460_v42 = vpack.c.bf16 %v217_v41, %v216_v40  ;;  %v463_v45 = vpack.c.bf16 %v219_v44, %v218_v43  ;;  %v220_v46 = vld [vmem:[%s650_s5 + $0x60] sm:$0xff]  ;;  %v221_v47 = vld [vmem:[%s650_s5 + $0x68] sm:$0xff]  ;;  %v222_v54 = vld [vmem:[%s650_s5 + $0x70] sm:$0xff] }
   0xc   :  { %v466_v48 = vpack.c.bf16 %v221_v47, %v220_v46  ;;  %v307_v49 = vld [vmem:[%s651_s2] ss:$0 sm:$0xff]  ;;  %v223_v55 = vld [vmem:[%s650_s5 + $0x78] sm:$0xff] }
   0xd   :  { %v469_v56 = vpack.c.bf16 %v223_v55, %v222_v54  ;;  %v310_v57 = vld [vmem:[%s652_s4] ss:$0 sm:$0xff] }
   0xe   :  { %431 = vmatpush3.bf16.msra.mxu1 %v430_v12  ;;  %452 = vmatpush3.bf16.msra.mxu0 %v451_v33  ;;  %v311_v62 = vld [vmem:[%s653_s6] ss:$0 sm:$0xff] }
   0xf   :  { %432 = vmatprep.subr.bf16.mxu1 %v476_v4  ;;  %453 = vmatprep.subr.bf16.mxu0 %v476_v4 }
  0x12   :  { %434 = vmatpush3.bf16.msra.mxu1 %v433_v15  ;;  %455 = vmatpush3.bf16.msra.mxu0 %v454_v36 }
  0x13   :  { %435 = vmatprep.subr.bf16.mxu1 %v476_v4  ;;  %456 = vmatprep.subr.bf16.mxu0 %v476_v4 }
  0x16   :  { %437 = vmatpush3.bf16.msra.mxu1 %v436_v18  ;;  %458 = vmatpush3.bf16.msra.mxu0 %v457_v39 }
  0x17   :  { %438 = vmatprep.subr.bf16.mxu1 %v476_v4  ;;  %459 = vmatprep.subr.bf16.mxu0 %v476_v4 }
  0x1a   :  { %440 = vmatpush3.bf16.msra.mxu1 %v439_v21  ;;  %461 = vmatpush3.bf16.msra.mxu0 %v460_v42 }
  0x1b   :  { %441 = vmatprep.subr.bf16.mxu1 %v476_v4  ;;  %462 = vmatprep.subr.bf16.mxu0 %v476_v4 }
  0x1e   :  { %443 = vmatpush3.bf16.msra.mxu1 %v442_v24  ;;  %464 = vmatpush3.bf16.msra.mxu0 %v463_v45 }
  0x1f   :  { %444 = vmatprep.subr.bf16.mxu1 %v476_v4  ;;  %465 = vmatprep.subr.bf16.mxu0 %v476_v4 }
  0x22   :  { %446 = vmatpush3.bf16.msra.mxu1 %v445_v27  ;;  %467 = vmatpush3.bf16.msra.mxu0 %v466_v48 }
  0x23   :  { %468 = vmatprep.subr.bf16.mxu0 %v476_v4 }
  0x26   :  { %470 = vmatpush3.bf16.msra.mxu0 %v469_v56 }
  0xd6   :  { %v109_v50 = vpop.f32.mrb[0].mxu0 }
  0xd7   :  { %v110_v51 = vadd.f32 %v307_v49, %v109_v50  ;;  %v352_v52 = vpop.f32.mrb[1].mxu0 }
  0xd9   :  { %v113_v53 = vmax.f32 %v110_v51, 0.0 }
  0xdb   :  { %386 = vmatmul.mubr.f32.vlgmr.msra.gmra.mrb[0].mxu1 %v113_v53 }
 0x1ae   :  { %v203_v58 = vpop.f32.mrb[0].mxu1 }
 0x1af   :  { %v204_v59 = vadd.f32 %v310_v57, %v203_v58  ;;  %v387_v60 = vpop.f32.mrb[1].mxu1 }
 0x1b1   :  { %v207_v61 = vmax.f32 %v204_v59, 0.0 }
 0x1b3   :  { %421 = vmatmul.mubr.f32.vlgmr.msra.gmra.mrb[2].mxu0 %v207_v61 }
 0x286   :  { %v297_v63 = vpop.f32.mrb[2].mxu0 }
 0x287   :  { %v298_v0 = vadd.f32 %v311_v62, %v297_v63  ;;  %v422_v1 = vpop.f32.mrb[3].mxu0 }
 0x289   :  { %302 = vst.msk [vmem:[%s654_s7] sm:$0xff] %vm301_vm3, %v298_v0 }

</bundles_post_ra>
